<compile_context>
chip_gen: v6e
topology: v6e:2x2x1
jax: 0.10.0
libtpu: 0.0.40
codegen_flags: <defaults>
</compile_context>

<pallas_src>
import math
import functools

import jax
import jax.numpy as jnp
from jax.experimental import pallas as pl
from jax.experimental.pallas import tpu as pltpu


# ----------------------------------------------------------------------------
# PE table construction (mirrors torch __init__; constant buffer, plain JAX)
# ----------------------------------------------------------------------------
def build_pe_table(max_len: int, d_model: int, dtype=jnp.float32) -> jnp.ndarray:
    position = jnp.arange(max_len, dtype=jnp.float32)[:, None]              # [L, 1]
    div_term = jnp.exp(
        jnp.arange(0, d_model, 2, dtype=jnp.float32) * (-math.log(10000.0) / d_model)
    )                                                                        # [D/2]
    ang = position * div_term                                                # [L, D/2]
    pe = jnp.zeros((max_len, d_model), jnp.float32)
    pe = pe.at[:, 0::2].set(jnp.sin(ang))
    pe = pe.at[:, 1::2].set(jnp.cos(ang))
    return pe.astype(dtype)


# ----------------------------------------------------------------------------
# Kernels (operate on the flat, lane-dense [rows, D] view)
# ----------------------------------------------------------------------------
def pe_add_kernel(x_ref, pe_ref, o_ref):
    o_ref[...] = x_ref[...] + pe_ref[...]


def pe_add_dropout_kernel(x_ref, pe_ref, bits_ref, o_ref, *, threshold, scale):
    # Inverted dropout fused with the PE add.  keep with prob (1 - p):
    # bits are uniform uint32; keep iff bits >= round(p * 2^32).
    y = x_ref[...] + pe_ref[...]
    keep = bits_ref[...] >= jnp.uint32(threshold)
    o_ref[...] = jnp.where(keep, y * scale, 0.0).astype(o_ref.dtype)


# ----------------------------------------------------------------------------
# Tile selection
# ----------------------------------------------------------------------------
_TARGET_BLOCK_BYTES = 2 * 1024 * 1024   # ~2 MiB per block; with <= 4 operands
                                        # double-buffered this is ~16 MiB VMEM,
                                        # safe on v5e/v6e/v7x while big enough
                                        # to sit near the HBM roofline.
_VMEM_LIMIT_BYTES = 32 * 1024 * 1024    # above v5e's 16 MiB scoped default,
                                        # within v7x's 64 MiB physical VMEM.


def _choose_row_tile(n_rows: int, row_bytes: int) -> int:
    rows = (_TARGET_BLOCK_BYTES // max(row_bytes, 1)) // 8 * 8
    rows = max(8, rows)
    if rows >= n_rows:
        return n_rows           # single full-extent block (exempt from (8,128))
    return int(rows)            # multiple of 8; last ragged block is masked


# ----------------------------------------------------------------------------
# Wrapper
# ----------------------------------------------------------------------------
def positional_encoding(x, pe_table, *, dropout_p=0.1, training=False, rng_key=None):
    """x: [S, B, D].  pe_table: [max_len, D].  Returns [S, B, D].

    Matches PositionalEncoding.forward: x + pe[:S] (broadcast over batch),
    followed by dropout (identity in eval mode / p == 0).
    """
    S, B, D = x.shape
    M = S * B

    # Lane-dense flat view: [S, B, D] is contiguous, so [S*B, D] is a pure view.
    x2 = x.reshape(M, D)
    # Pre-broadcast PE over the batch on the host so the kernel is a plain
    # 2-D elementwise add on lane-dense slabs (layout plumbing, not compute).
    pe_flat = jnp.broadcast_to(pe_table[:S][:, None, :], (S, B, D)) \
                 .reshape(M, D).astype(x.dtype)

    row_bytes = D * x2.dtype.itemsize
    tm = _choose_row_tile(M, row_bytes)
    grid = (pl.cdiv(M, tm),)

    blk = pl.BlockSpec((tm, D), lambda i: (i, 0))
    out_shape = jax.ShapeDtypeStruct((M, D), x.dtype)
    cparams = pltpu.CompilerParams(
        dimension_semantics=("parallel",),       # independent tiles -> both v7x TCs
        vmem_limit_bytes=_VMEM_LIMIT_BYTES,
    )

    if (not training) or dropout_p == 0.0:
        # Eval mode: dropout is identity (matches nn.Dropout.eval()).
        out2 = pl.pallas_call(
            pe_add_kernel,
            out_shape=out_shape,
            grid=grid,
            in_specs=[blk, blk],
            out_specs=blk,
            compiler_params=cparams,
        )(x2, pe_flat)
        return out2.reshape(S, B, D)

    p = float(dropout_p)
    if p >= 1.0:
        # torch nn.Dropout(p=1.0) zeroes everything.
        return jnp.zeros_like(x)

    if rng_key is None:
        rng_key = jax.random.PRNGKey(0)
    # Host-side random bits (interpret-safe; replaces pltpu.prng_seed).
    bits = jax.random.bits(rng_key, (M, D), dtype=jnp.uint32)

    threshold = min(int(round(p * (2 ** 32))), 2 ** 32 - 1)
    kernel = functools.partial(
        pe_add_dropout_kernel, threshold=threshold, scale=1.0 / (1.0 - p)
    )
    out2 = pl.pallas_call(
        kernel,
        out_shape=out_shape,
        grid=grid,
        in_specs=[blk, blk, blk],
        out_specs=blk,
        compiler_params=cparams,
    )(x2, pe_flat, bits)
    return out2.reshape(S, B, D)


# ----------------------------------------------------------------------------
# Main
# ----------------------------------------------------------------------------
if __name__ == "__main__":
    S, B, D = 16, 2, 32           # seq len, batch, embed dim
    MAX_LEN = 64                  # shrunk max_len (module default is 5000)

    key = jax.random.PRNGKey(0)
    kx, kdrop = jax.random.split(key)
    x = jax.random.normal(kx, (S, B, D), dtype=jnp.float32)

    pe_table = build_pe_table(MAX_LEN, D)
    ref = x + pe_table[:S][:, None, :]

    # Eval-mode forward (deterministic), compare vs pure-JAX reference.
    out = positional_encoding(x, pe_table, dropout_p=0.1, training=False)
    out = jax.block_until_ready(out)
    assert out.shape == (S, B, D)
    assert jnp.allclose(out, ref, atol=1e-6, rtol=1e-6), "eval mismatch vs reference"

    # Training-mode forward (fused add + dropout).
    p = 0.1
    out_train = positional_encoding(x, pe_table, dropout_p=p, training=True,
                                    rng_key=kdrop)
    out_train = jax.block_until_ready(out_train)
    assert out_train.shape == (S, B, D)
    # Surviving elements must equal (x + pe) / (1 - p); dropped elements are 0.
    kept = out_train != 0
    assert jnp.allclose(jnp.where(kept, out_train, 0.0),
                        jnp.where(kept, ref / (1.0 - p), 0.0),
                        atol=1e-5, rtol=1e-5), "train-mode kept values mismatch"

    print("KERNEL_OK")
</pallas_src>

<mosaic_0001>
module attributes {stable_mosaic.version = 11 : i64} {
  func.func @pe_add_kernel(%arg0: i32, %arg1: memref<32x32xf32, #tpu.memory_space<vmem>>, %arg2: memref<32x32xf32, #tpu.memory_space<vmem>>, %arg3: memref<32x32xf32, #tpu.memory_space<vmem>>) attributes {dimension_semantics = [#tpu.dimension_semantics<parallel>], iteration_bounds = array<i64: 1>, scalar_prefetch = 0 : i64, scratch_operands = 0 : i64, tpu.core_type = #tpu.core_type<tc>, window_params = [{transform_indices = @transform_0, window_bounds = array<i64: 32, 32>}, {transform_indices = @transform_1, window_bounds = array<i64: 32, 32>}, {transform_indices = @transform_2, window_bounds = array<i64: 32, 32>}]} {
    %c0 = arith.constant 0 : index
    %c0_0 = arith.constant 0 : index
    %0 = vector.load %arg1[%c0, %c0_0] : memref<32x32xf32, #tpu.memory_space<vmem>>, vector<32x32xf32>
    %c0_1 = arith.constant 0 : index
    %c0_2 = arith.constant 0 : index
    %1 = vector.load %arg2[%c0_1, %c0_2] : memref<32x32xf32, #tpu.memory_space<vmem>>, vector<32x32xf32>
    %2 = arith.addf %0, %1 : vector<32x32xf32>
    %c0_3 = arith.constant 0 : index
    %c0_4 = arith.constant 0 : index
    %3 = vector.load %arg3[%c0_3, %c0_4] : memref<32x32xf32, #tpu.memory_space<vmem>>, vector<32x32xf32>
    tpu.vector_store %arg3[%c0_3, %c0_4], %2 {strides = array<i32>} : memref<32x32xf32, #tpu.memory_space<vmem>>, vector<32x32xf32>,
    return
  }
  func.func @transform_0(%arg0: i32) -> (i32, i32) {
    %c0_i32 = arith.constant 0 : i32
    %c0_i32_0 = arith.constant 0 : i32
    return %arg0, %c0_i32 : i32, i32
  }
  func.func @transform_1(%arg0: i32) -> (i32, i32) {
    %c0_i32 = arith.constant 0 : i32
    %c0_i32_0 = arith.constant 0 : i32
    return %arg0, %c0_i32 : i32, i32
  }
  func.func @transform_2(%arg0: i32) -> (i32, i32) {
    %c0_i32 = arith.constant 0 : i32
    %c0_i32_0 = arith.constant 0 : i32
    return %arg0, %c0_i32 : i32, i32
  }
}

</mosaic_0001>

<bundles_post_ra>
// kernel: tpu_custom_call.1
= control target key start
LH: loop header
LB: loop body
LE: loop exit
PB: predicated region body
PF: predicated region fallthrough
CT: control target
= control target key end

     0   :  { %7 = vsyncpa [#allocation3], 0  ;;  %s188_s0 = inlined_call_operand.hbm [shape: f32[32,32], index: 0, kind: input, shape index: {}]   ;;  %s189_s1 = inlined_call_operand.hbm [shape: f32[32,32], index: 1, kind: input, shape index: {}]   ;;  %s190_s2 = inlined_call_operand.hbm [shape: f32[32,32], index: 2, kind: output, shape index: {}]  }
   0x1   :  { %8 = vsyncpa [#allocation6], 0 }
   0x2   :  { %9 = vsyncpa [#allocation4], 0  ;;  %s146_s9 = smov [#allocation2]  }
   0x3   :  { %s15_s10 = sshll.u32 %s146_s9, 4  ;;  %s16_s10 = int_to_ptr.vmem [resolvable:$true] %s15_s10 }
   0x4   :  { %s88_s11 = scalar_lea.vmem %s16_s10, 512  ;;  %p93_p1 = scmp.lt.s32.totalorder %s16_s10, %s16_s10 }
   0x5   :  { %p89_p0 = scmp.ne.s32.totalorder %s16_s10, %s88_s11  ;;  %p94_p2 = scmp.lt.s32.totalorder %s88_s11, %s88_s11 }
   0x7   :  { %p95_p3 = por %p94_p2, %p93_p1 }
   0x9   :  { %p96_p4 = pnand %p95_p3, %p89_p0 }
   0xb   :  { %99 = shalt.err (!%p96_p4)
}
   0xc   :  { %s147_s12 = smov 128   ;;  %s148_s13 = smov 8  }
   0xd   :  { %21 = dma.hbm_to_vmem [thread:$0]  %s188_s0, 512, %s16_s10, [#allocation3], %s147_s12, %s147_s12, %s148_s13  }
   0xe   :  { %s149_s16 = smov [#allocation5]  }
   0xf   :  { %s27_s17 = sshll.u32 %s149_s16, 4  ;;  %s28_s17 = int_to_ptr.vmem [resolvable:$true] %s27_s17 }
  0x10   :  { %s108_s18 = scalar_lea.vmem %s28_s17, 512  ;;  %p113_p6 = scmp.lt.s32.totalorder %s28_s17, %s28_s17 }
  0x11   :  { %p109_p5 = scmp.ne.s32.totalorder %s28_s17, %s108_s18  ;;  %p114_p7 = scmp.lt.s32.totalorder %s108_s18, %s108_s18 }
  0x13   :  { %p115_p8 = por %p114_p7, %p113_p6 }
  0x15   :  { %p116_p9 = pnand %p115_p8, %p109_p5 }
  0x17   :  { %119 = shalt.err (!%p116_p9)
}
  0x18   :  { %33 = dma.hbm_to_vmem [thread:$0]  %s189_s1, 512, %s28_s17, [#allocation6], %s147_s12, %s147_s12, %s148_s13  }
  0x19   :  { %140 = dma.done.wait [#allocation3], 512  }
  0x1a   :  { %141 = vsyncadd [#allocation3], 4294966784 }
  0x1b   :  { %142 = dma.done.wait [#allocation6], 512  }
  0x1c   :  { %143 = vsyncadd [#allocation6], 4294966784  ;;  %v40_v0 = vld [vmem:[#allocation2] sm:$0xff]  ;;  %vm52_vm0 = vcmask 261120   ;;  %v41_v2 = vld [vmem:[#allocation2 + $0x8] sm:$0xff]  ;;  %s150_s0 = smov [#allocation7]  }
  0x1d   :  { %v44_v1 = vld [vmem:[#allocation5] sm:$0xff]  ;;  %s62_s21 = sshll.u32 %s150_s0, 4  ;;  %v45_v4 = vld [vmem:[#allocation5 + $0x8] sm:$0xff]  ;;  %v42_v5 = vld [vmem:[#allocation2 + $0x10] sm:$0xff]  ;;  %s63_s21 = int_to_ptr.vmem [resolvable:$true] %s62_s21 }
  0x1e   :  { %v48_v3 = vadd.f32 %v44_v1, %v40_v0  ;;  %v46_v6 = vld [vmem:[#allocation5 + $0x10] sm:$0xff]  ;;  %v49_v7 = vadd.f32 %v45_v4, %v41_v2  ;;  %v43_v9 = vld [vmem:[#allocation2 + $0x18] sm:$0xff]  ;;  %s120_s1 = scalar_lea.vmem %s63_s21, 512  ;;  %p125_p11 = scmp.lt.s32.totalorder %s63_s21, %s63_s21 }
  0x1f   :  { %v50_v8 = vadd.f32 %v46_v6, %v42_v5  ;;  %v47_v10 = vld [vmem:[#allocation5 + $0x18] sm:$0xff]  ;;  %p121_p10 = scmp.ne.s32.totalorder %s63_s21, %s120_s1  ;;  %p126_p12 = scmp.lt.s32.totalorder %s120_s1, %s120_s1 }
  0x20   :  { %53 = vst.msk [vmem:[#allocation7] sm:$0xff] %vm52_vm0, %v48_v3  ;;  %v51_v11 = vadd.f32 %v47_v10, %v43_v9  ;;  %54 = vst.msk [vmem:[#allocation7 + $0x8] sm:$0xff] %vm52_vm0, %v49_v7 }
  0x21   :  { %55 = vst.msk [vmem:[#allocation7 + $0x10] sm:$0xff] %vm52_vm0, %v50_v8  ;;  %p127_p13 = por %p126_p12, %p125_p11 }
  0x22   :  { %56 = vst.msk [vmem:[#allocation7 + $0x18] sm:$0xff] %vm52_vm0, %v51_v11 }
  0x23   :  { %p128_p0 = pnand %p127_p13, %p121_p10 }
  0x25   :  { %131 = shalt.err (!%p128_p0)
}
  0x26   :  { %68 = dma.vmem_to_hbm [thread:$0]  %s63_s21, 512, %s190_s2, [#allocation4], %s147_s12, %s147_s12, %s148_s13  }
  0x27   :  { %144 = dma.done.wait [#allocation4], 512  }
  0x28   :  { %145 = vsyncadd [#allocation4], 4294966784 }
  0x29   :  { %72 = vsyncpa [#allocation3], 1 }
  0x2a   :  { %73 = vsyncpa [#allocation6], 1 }
  0x2b   :  { %74 = vsyncpa [#allocation4], 1 }

</bundles_post_ra>
